<compile_context>
chip_gen: v7x
topology: tpu7x:2x2x1
jax: 0.10.0
libtpu: 0.0.40
codegen_flags: <defaults>
</compile_context>

<pallas_src>
import jax
import jax.numpy as jnp
from jax import lax
from jax.experimental import pallas as pl
from jax.experimental.pallas import tpu as pltpu


_LANES = 128          # vreg lane width
_CHUNK_ROWS = 256     # in-kernel row-chunk size (bounds the f32 working set)
_MAX_FOLD = 16        # max logical rows folded into one 128-lane slab


def _vmem_capacity_bytes():
    """Physical VMEM per TensorCore; conservative (v7x = 64 MiB) fallback."""
    try:
        info = pltpu.get_tpu_info()
        cap = getattr(info, "vmem_capacity_bytes", None)
        if cap:
            return int(cap)
    except Exception:
        pass
    return 64 << 20


def _round_down(v, m):
    return (v // m) * m


def _pick_block_rows(B, W, itemsize, target_tile_bytes):
    """Row-tile height for the (rows, W) input block.

    Always a multiple of the sublane packing (8/16/32 rows) or the full batch,
    so the (8,128) BlockSpec divisibility rule is never violated; sized to
    roughly `target_tile_bytes`; nudged so small grids have an even number of
    steps (v7x shards the "parallel" grid axis across its two TensorCores).
    """
    row_mult = 8 * max(1, 4 // max(1, itemsize))          # 8 f32 / 16 bf16 / 32 i8
    if B <= row_mult:
        return B                                           # full-extent block: legal
    rows = max(row_mult, int(target_tile_bytes) // max(1, W * itemsize))
    rows = min(rows, B)
    quant = _CHUNK_ROWS if rows >= _CHUNK_ROWS else row_mult
    rows = max(row_mult, _round_down(rows, quant))
    if rows >= B:
        # Whole batch fits one tile: split it so the grid pipelines and both
        # v7x TensorCores get work.
        half = pl.cdiv(B, 2)
        q = _CHUNK_ROWS if half >= _CHUNK_ROWS else row_mult
        rows = max(row_mult, pl.cdiv(half, q) * q)
    steps = pl.cdiv(B, rows)
    if 1 < steps <= 8 and steps % 2 == 1:                  # prefer even step count
        tgt = pl.cdiv(B, steps + 1)
        q = _CHUNK_ROWS if tgt >= _CHUNK_ROWS else row_mult
        cand = min(rows, max(row_mult, pl.cdiv(tgt, q) * q))
        if pl.cdiv(B, cand) % 2 == 0:
            rows = cand
    return min(rows, B)


def _pick_chunk(block_rows, row_mult):
    """In-kernel row-chunk size: divides block_rows, multiple of the packing."""
    if block_rows <= _CHUNK_ROWS:
        return block_rows, 1
    for c in (256, 128, 64, 32, 16, 8):
        if c % row_mult == 0 and block_rows % c == 0:
            return c, block_rows // c
    return block_rows, 1


def _make_kernel(*, eps, inv_d, n_seg, chunk_rows, n_chunks, unroll):
    """Build the LayerNorm kernel body.

    The block is (rows, W).  If n_seg > 1, W = n_seg * emb_dim: n_seg logical
    rows were folded into each 128-lane slab in the wrapper (free reshape) and
    mask_ref holds (n_seg, W) 0/1 segment indicators used for exact segmented
    sum / sum-of-squares at full lane width (no padding, no matmul).
    """

    def _normalize(x, scale, shift, masks, out_dtype):
        if n_seg == 1:
            sums = jnp.sum(x, axis=-1, keepdims=True)          # (rows, 1)
            sumsq = jnp.sum(x * x, axis=-1, keepdims=True)
        else:
            xx = x * x
            sums = jnp.zeros_like(x)                           # (rows, W)
            sumsq = jnp.zeros_like(x)
            for j in range(n_seg):                             # static unroll
                m = masks[j:j + 1, :]                          # (1, W) 0/1
                sums = sums + jnp.sum(x * m, axis=-1, keepdims=True) * m
                sumsq = sumsq + jnp.sum(xx * m, axis=-1, keepdims=True) * m
        mean = sums * inv_d
        var = jnp.maximum(sumsq * inv_d - mean * mean, 0.0)     # unbiased=False
        inv_std = lax.rsqrt(var + eps)                          # EUP slot
        return ((x - mean) * inv_std * scale + shift).astype(out_dtype)

    def kernel(x_ref, scale_ref, shift_ref, mask_ref, o_ref):
        scale = scale_ref[...].astype(jnp.float32)              # (1, W) broadcast
        shift = shift_ref[...].astype(jnp.float32)
        masks = mask_ref[...] if n_seg > 1 else None

        if n_chunks == 1:
            x = x_ref[...].astype(jnp.float32)
            o_ref[...] = _normalize(x, scale, shift, masks, o_ref.dtype)
        else:
            def body(c, carry):
                r0 = pl.multiple_of(c * chunk_rows, chunk_rows)
                x = x_ref[pl.ds(r0, chunk_rows), :].astype(jnp.float32)
                o_ref[pl.ds(r0, chunk_rows), :] = _normalize(
                    x, scale, shift, masks, o_ref.dtype)
                return carry
            lax.fori_loop(0, n_chunks, body, 0, unroll=unroll)

    return kernel


def layer_norm(x, scale, shift, *, eps=1e-5, block_rows=None,
               target_tile_bytes=None):
    """LayerNorm over the last dim of x (any leading shape)."""
    orig_shape = x.shape
    D = orig_shape[-1]
    x2 = x.reshape(-1, D)
    B = x2.shape[0]
    itemsize = jnp.dtype(x.dtype).itemsize
    row_mult = 8 * max(1, 4 // max(1, itemsize))

    vmem_cap = _vmem_capacity_bytes()
    if target_tile_bytes is None:
        # Bigger tiles on 128 MiB-VMEM parts (v5e/v6e, lowest HBM BW), smaller
        # on v7x (64 MiB VMEM per TensorCore).
        target_tile_bytes = (8 << 20) if vmem_cap >= (100 << 20) else (4 << 20)

    # ---- lane-dense layout --------------------------------------------------
    n_seg = 1
    if D % _LANES != 0 and _LANES % D == 0:
        k = _LANES // D
        if 1 < k <= _MAX_FOLD and B % k == 0:
            n_seg = k
    W = D * n_seg
    Bk = B // n_seg

    if n_seg > 1:
        x2 = x2.reshape(Bk, W)                                  # free reshape
        scale2d = jnp.tile(scale.reshape(-1), n_seg).reshape(1, W)
        shift2d = jnp.tile(shift.reshape(-1), n_seg).reshape(1, W)
        seg_id = jnp.arange(W, dtype=jnp.int32) // D
        masks = (seg_id[None, :] ==
                 jnp.arange(n_seg, dtype=jnp.int32)[:, None]).astype(jnp.float32)
    else:
        # TODO(synk): D not a multiple of 128 and not foldable (e.g. D=5) falls
        # back to a full-extent lane dim (correct, partially masked stores).
        scale2d = scale.reshape(1, W)
        shift2d = shift.reshape(1, W)
        masks = jnp.ones((1, W), jnp.float32)                   # unused

    # ---- tiling -------------------------------------------------------------
    if block_rows is None:
        block_rows = _pick_block_rows(Bk, W, itemsize, target_tile_bytes)
    block_rows = max(1, min(int(block_rows), Bk))
    chunk_rows, n_chunks = _pick_chunk(block_rows, row_mult)
    n_steps = pl.cdiv(Bk, block_rows)

    # ---- VMEM budget (generation-aware cap: ~70% of physical VMEM) ----------
    in_bufs = 3 if n_steps >= 4 else 2
    io_tile = block_rows * W * itemsize
    work_f32 = 8 * chunk_rows * W * 4
    side = (masks.shape[0] * W + 4 * W) * 4
    vmem_budget = in_bufs * io_tile + 2 * io_tile + work_f32 + side + (2 << 20)
    vmem_ceiling = max(16 << 20, int(vmem_cap * 0.70))
    vmem_limit = int(min(max(vmem_budget, 16 << 20), vmem_ceiling))

    kernel = _make_kernel(eps=float(eps), inv_d=float(1.0 / D), n_seg=n_seg,
                          chunk_rows=chunk_rows, n_chunks=n_chunks,
                          unroll=bool(n_chunks <= 8))

    x_index = lambda i: (i, 0)
    x_spec = pl.BlockSpec((block_rows, W), x_index)
    if n_steps >= 4:
        # Deeper input pipelining for the pure-streaming case; fall back
        # silently if this jax version has no pipeline_mode / Buffered.
        try:
            x_spec = pl.BlockSpec((block_rows, W), x_index,
                                  pipeline_mode=pl.Buffered(3))
        except Exception:
            pass

    in_specs = [
        x_spec,
        pl.BlockSpec((1, W), lambda i: (0, 0)),
        pl.BlockSpec((1, W), lambda i: (0, 0)),
        pl.BlockSpec((masks.shape[0], W), lambda i: (0, 0)),
    ]
    out_spec = pl.BlockSpec((block_rows, W), x_index)

    cost = pl.CostEstimate(
        flops=int((10 + 6 * n_seg) * B * D),
        transcendentals=int(B),
        bytes_accessed=int(2 * B * D * itemsize + 2 * D * itemsize),
    )

    out = pl.pallas_call(
        kernel,
        out_shape=jax.ShapeDtypeStruct((Bk, W), x.dtype),
        grid_spec=pltpu.PrefetchScalarGridSpec(
            num_scalar_prefetch=0,
            grid=(n_steps,),
            in_specs=in_specs,
            out_specs=out_spec,
        ),
        compiler_params=pltpu.CompilerParams(
            dimension_semantics=("parallel",),
            vmem_limit_bytes=vmem_limit,
        ),
        cost_estimate=cost,
    )(x2, scale2d, shift2d, masks)

    return out.reshape(orig_shape)


if __name__ == "__main__":
    key = jax.random.PRNGKey(0)
    k1, k2 = jax.random.split(key)

    def ref_layernorm(x, scale, shift, eps=1e-5):
        mean = jnp.mean(x, axis=-1, keepdims=True)
        var = jnp.mean((x - mean) ** 2, axis=-1, keepdims=True)
        return scale * ((x - mean) / jnp.sqrt(var + eps)) + shift

    # Case 1: hidden=32 -> folded lane-dense path (4 rows per 128-lane slab).
    B1, D1 = 8, 32
    x1 = jax.random.normal(k1, (B1, D1), dtype=jnp.float32)
    scale1 = jnp.ones((D1,), jnp.float32)   # nn.Parameter(torch.ones(emb_dim))
    shift1 = jnp.zeros((D1,), jnp.float32)  # nn.Parameter(torch.zeros(emb_dim))
    out1 = jax.block_until_ready(layer_norm(x1, scale1, shift1))
    ref1 = ref_layernorm(x1, scale1, shift1)
    assert jnp.allclose(out1, ref1, atol=1e-5, rtol=1e-5), "mismatch (D=32)"

    # Case 2: emb_dim=5, batch=2 exactly as in the original module (fallback path).
    B2, D2 = 2, 5
    x2 = jax.random.normal(k2, (B2, D2), dtype=jnp.float32)
    scale2 = jnp.ones((D2,), jnp.float32)
    shift2 = jnp.zeros((D2,), jnp.float32)
    out2 = jax.block_until_ready(layer_norm(x2, scale2, shift2))
    ref2 = ref_layernorm(x2, scale2, shift2)
    assert jnp.allclose(out2, ref2, atol=1e-5, rtol=1e-5), "mismatch (D=5)"

    print("KERNEL_OK")
</pallas_src>

<mosaic_0001>
module attributes {stable_mosaic.version = 11 : i64} {
  func.func @kernel(%arg0: i32, %arg1: memref<2x128xf32, #tpu.memory_space<vmem>>, %arg2: memref<1x128xf32, #tpu.memory_space<vmem>>, %arg3: memref<1x128xf32, #tpu.memory_space<vmem>>, %arg4: memref<4x128xf32, #tpu.memory_space<vmem>>, %arg5: memref<2x128xf32, #tpu.memory_space<vmem>>) attributes {dimension_semantics = [#tpu.dimension_semantics<parallel>], iteration_bounds = array<i64: 1>, scalar_prefetch = 0 : i64, scratch_operands = 0 : i64, tpu.core_type = #tpu.core_type<tc>, window_params = [{transform_indices = @transform_0, window_bounds = array<i64: 2, 128>}, {pipeline_mode = #tpu.pipeline_mode<synchronous>, transform_indices = @transform_1, window_bounds = array<i64: 1, 128>}, {pipeline_mode = #tpu.pipeline_mode<synchronous>, transform_indices = @transform_2, window_bounds = array<i64: 1, 128>}, {pipeline_mode = #tpu.pipeline_mode<synchronous>, transform_indices = @transform_3, window_bounds = array<i64: 4, 128>}, {transform_indices = @transform_4, window_bounds = array<i64: 2, 128>}]} {
    %c0 = arith.constant 0 : index
    %c0_0 = arith.constant 0 : index
    %0 = vector.load %arg2[%c0, %c0_0] : memref<1x128xf32, #tpu.memory_space<vmem>>, vector<1x128xf32>
    %c0_1 = arith.constant 0 : index
    %c0_2 = arith.constant 0 : index
    %1 = vector.load %arg3[%c0_1, %c0_2] : memref<1x128xf32, #tpu.memory_space<vmem>>, vector<1x128xf32>
    %c0_3 = arith.constant 0 : index
    %c0_4 = arith.constant 0 : index
    %2 = vector.load %arg4[%c0_3, %c0_4] : memref<4x128xf32, #tpu.memory_space<vmem>>, vector<4x128xf32>
    %c0_5 = arith.constant 0 : index
    %c0_6 = arith.constant 0 : index
    %3 = vector.load %arg1[%c0_5, %c0_6] : memref<2x128xf32, #tpu.memory_space<vmem>>, vector<2x128xf32>
    %4 = arith.mulf %3, %3 : vector<2x128xf32>
    %cst = arith.constant 0.000000e+00 : f32
    %5 = vector.broadcast %cst : f32 to vector<2x128xf32>
    %cst_7 = arith.constant 0.000000e+00 : f32
    %6 = vector.broadcast %cst_7 : f32 to vector<2x128xf32>
    %7 = vector.extract_strided_slice %2 {offsets = [0, 0], sizes = [1, 128], strides = [1, 1]} : vector<4x128xf32> to vector<1x128xf32>
    %8 = vector.broadcast %7 : vector<1x128xf32> to vector<2x128xf32>
    %9 = arith.mulf %3, %8 : vector<2x128xf32>
    %cst_8 = arith.constant dense<0.000000e+00> : vector<2xf32>
    %10 = vector.multi_reduction <add>, %9, %cst_8 [1] : vector<2x128xf32> to vector<2xf32>
    %11 = vector.shape_cast %10 : vector<2xf32> to vector<2x1xf32>
    %12 = vector.broadcast %11 : vector<2x1xf32> to vector<2x128xf32>
    %13 = vector.broadcast %7 : vector<1x128xf32> to vector<2x128xf32>
    %14 = arith.mulf %12, %13 : vector<2x128xf32>
    %15 = arith.addf %5, %14 : vector<2x128xf32>
    %16 = vector.broadcast %7 : vector<1x128xf32> to vector<2x128xf32>
    %17 = arith.mulf %4, %16 : vector<2x128xf32>
    %cst_9 = arith.constant dense<0.000000e+00> : vector<2xf32>
    %18 = vector.multi_reduction <add>, %17, %cst_9 [1] : vector<2x128xf32> to vector<2xf32>
    %19 = vector.shape_cast %18 : vector<2xf32> to vector<2x1xf32>
    %20 = vector.broadcast %19 : vector<2x1xf32> to vector<2x128xf32>
    %21 = vector.broadcast %7 : vector<1x128xf32> to vector<2x128xf32>
    %22 = arith.mulf %20, %21 : vector<2x128xf32>
    %23 = arith.addf %6, %22 : vector<2x128xf32>
    %24 = vector.extract_strided_slice %2 {offsets = [1, 0], sizes = [1, 128], strides = [1, 1]} : vector<4x128xf32> to vector<1x128xf32>
    %25 = vector.broadcast %24 : vector<1x128xf32> to vector<2x128xf32>
    %26 = arith.mulf %3, %25 : vector<2x128xf32>
    %cst_10 = arith.constant dense<0.000000e+00> : vector<2xf32>
    %27 = vector.multi_reduction <add>, %26, %cst_10 [1] : vector<2x128xf32> to vector<2xf32>
    %28 = vector.shape_cast %27 : vector<2xf32> to vector<2x1xf32>
    %29 = vector.broadcast %28 : vector<2x1xf32> to vector<2x128xf32>
    %30 = vector.broadcast %24 : vector<1x128xf32> to vector<2x128xf32>
    %31 = arith.mulf %29, %30 : vector<2x128xf32>
    %32 = arith.addf %15, %31 : vector<2x128xf32>
    %33 = vector.broadcast %24 : vector<1x128xf32> to vector<2x128xf32>
    %34 = arith.mulf %4, %33 : vector<2x128xf32>
    %cst_11 = arith.constant dense<0.000000e+00> : vector<2xf32>
    %35 = vector.multi_reduction <add>, %34, %cst_11 [1] : vector<2x128xf32> to vector<2xf32>
    %36 = vector.shape_cast %35 : vector<2xf32> to vector<2x1xf32>
    %37 = vector.broadcast %36 : vector<2x1xf32> to vector<2x128xf32>
    %38 = vector.broadcast %24 : vector<1x128xf32> to vector<2x128xf32>
    %39 = arith.mulf %37, %38 : vector<2x128xf32>
    %40 = arith.addf %23, %39 : vector<2x128xf32>
    %41 = vector.extract_strided_slice %2 {offsets = [2, 0], sizes = [1, 128], strides = [1, 1]} : vector<4x128xf32> to vector<1x128xf32>
    %42 = vector.broadcast %41 : vector<1x128xf32> to vector<2x128xf32>
    %43 = arith.mulf %3, %42 : vector<2x128xf32>
    %cst_12 = arith.constant dense<0.000000e+00> : vector<2xf32>
    %44 = vector.multi_reduction <add>, %43, %cst_12 [1] : vector<2x128xf32> to vector<2xf32>
    %45 = vector.shape_cast %44 : vector<2xf32> to vector<2x1xf32>
    %46 = vector.broadcast %45 : vector<2x1xf32> to vector<2x128xf32>
    %47 = vector.broadcast %41 : vector<1x128xf32> to vector<2x128xf32>
    %48 = arith.mulf %46, %47 : vector<2x128xf32>
    %49 = arith.addf %32, %48 : vector<2x128xf32>
    %50 = vector.broadcast %41 : vector<1x128xf32> to vector<2x128xf32>
    %51 = arith.mulf %4, %50 : vector<2x128xf32>
    %cst_13 = arith.constant dense<0.000000e+00> : vector<2xf32>
    %52 = vector.multi_reduction <add>, %51, %cst_13 [1] : vector<2x128xf32> to vector<2xf32>
    %53 = vector.shape_cast %52 : vector<2xf32> to vector<2x1xf32>
    %54 = vector.broadcast %53 : vector<2x1xf32> to vector<2x128xf32>
    %55 = vector.broadcast %41 : vector<1x128xf32> to vector<2x128xf32>
    %56 = arith.mulf %54, %55 : vector<2x128xf32>
    %57 = arith.addf %40, %56 : vector<2x128xf32>
    %58 = vector.extract_strided_slice %2 {offsets = [3, 0], sizes = [1, 128], strides = [1, 1]} : vector<4x128xf32> to vector<1x128xf32>
    %59 = vector.broadcast %58 : vector<1x128xf32> to vector<2x128xf32>
    %60 = arith.mulf %3, %59 : vector<2x128xf32>
    %cst_14 = arith.constant dense<0.000000e+00> : vector<2xf32>
    %61 = vector.multi_reduction <add>, %60, %cst_14 [1] : vector<2x128xf32> to vector<2xf32>
    %62 = vector.shape_cast %61 : vector<2xf32> to vector<2x1xf32>
    %63 = vector.broadcast %62 : vector<2x1xf32> to vector<2x128xf32>
    %64 = vector.broadcast %58 : vector<1x128xf32> to vector<2x128xf32>
    %65 = arith.mulf %63, %64 : vector<2x128xf32>
    %66 = arith.addf %49, %65 : vector<2x128xf32>
    %67 = vector.broadcast %58 : vector<1x128xf32> to vector<2x128xf32>
    %68 = arith.mulf %4, %67 : vector<2x128xf32>
    %cst_15 = arith.constant dense<0.000000e+00> : vector<2xf32>
    %69 = vector.multi_reduction <add>, %68, %cst_15 [1] : vector<2x128xf32> to vector<2xf32>
    %70 = vector.shape_cast %69 : vector<2xf32> to vector<2x1xf32>
    %71 = vector.broadcast %70 : vector<2x1xf32> to vector<2x128xf32>
    %72 = vector.broadcast %58 : vector<1x128xf32> to vector<2x128xf32>
    %73 = arith.mulf %71, %72 : vector<2x128xf32>
    %74 = arith.addf %57, %73 : vector<2x128xf32>
    %cst_16 = arith.constant 3.125000e-02 : f32
    %75 = vector.broadcast %cst_16 : f32 to vector<2x128xf32>
    %76 = arith.mulf %66, %75 : vector<2x128xf32>
    %cst_17 = arith.constant 3.125000e-02 : f32
    %77 = vector.broadcast %cst_17 : f32 to vector<2x128xf32>
    %78 = arith.mulf %74, %77 : vector<2x128xf32>
    %79 = arith.mulf %76, %76 : vector<2x128xf32>
    %80 = arith.subf %78, %79 : vector<2x128xf32>
    %cst_18 = arith.constant 0.000000e+00 : f32
    %81 = vector.broadcast %cst_18 : f32 to vector<2x128xf32>
    %82 = arith.maximumf %80, %81 : vector<2x128xf32>
    %cst_19 = arith.constant 9.99999974E-6 : f32
    %83 = vector.broadcast %cst_19 : f32 to vector<2x128xf32>
    %84 = arith.addf %82, %83 : vector<2x128xf32>
    %85 = math.rsqrt %84 : vector<2x128xf32>
    %86 = arith.subf %3, %76 : vector<2x128xf32>
    %87 = arith.mulf %86, %85 : vector<2x128xf32>
    %88 = vector.broadcast %0 : vector<1x128xf32> to vector<2x128xf32>
    %89 = arith.mulf %87, %88 : vector<2x128xf32>
    %90 = vector.broadcast %1 : vector<1x128xf32> to vector<2x128xf32>
    %91 = arith.addf %89, %90 : vector<2x128xf32>
    %c0_20 = arith.constant 0 : index
    %c0_21 = arith.constant 0 : index
    %92 = vector.load %arg5[%c0_20, %c0_21] : memref<2x128xf32, #tpu.memory_space<vmem>>, vector<2x128xf32>
    tpu.vector_store %arg5[%c0_20, %c0_21], %91 {strides = array<i32>} : memref<2x128xf32, #tpu.memory_space<vmem>>, vector<2x128xf32>,
    return
  }
  func.func @transform_0(%arg0: i32) -> (i32, i32) {
    %c0_i32 = arith.constant 0 : i32
    %c0_i32_0 = arith.constant 0 : i32
    return %arg0, %c0_i32 : i32, i32
  }
  func.func @transform_1(%arg0: i32) -> (i32, i32) {
    %c0_i32 = arith.constant 0 : i32
    %c0_i32_0 = arith.constant 0 : i32
    %c0_i32_1 = arith.constant 0 : i32
    return %c0_i32, %c0_i32_0 : i32, i32
  }
  func.func @transform_2(%arg0: i32) -> (i32, i32) {
    %c0_i32 = arith.constant 0 : i32
    %c0_i32_0 = arith.constant 0 : i32
    %c0_i32_1 = arith.constant 0 : i32
    return %c0_i32, %c0_i32_0 : i32, i32
  }
  func.func @transform_3(%arg0: i32) -> (i32, i32) {
    %c0_i32 = arith.constant 0 : i32
    %c0_i32_0 = arith.constant 0 : i32
    %c0_i32_1 = arith.constant 0 : i32
    return %c0_i32, %c0_i32_0 : i32, i32
  }
  func.func @transform_4(%arg0: i32) -> (i32, i32) {
    %c0_i32 = arith.constant 0 : i32
    %c0_i32_0 = arith.constant 0 : i32
    return %arg0, %c0_i32 : i32, i32
  }
}

</mosaic_0001>

<bundles_post_ra>
// kernel: tpu_custom_call.1
= control target key start
LH: loop header
LB: loop body
LE: loop exit
PB: predicated region body
PF: predicated region fallthrough
CT: control target
= control target key end

     0   :  { %9 = vsyncpa [#allocation3], 0  ;;  %s270_s0 = inlined_call_operand.hbm [shape: f32[2,128], index: 0, kind: input, shape index: {}]   ;;  %s271_s1 = inlined_call_operand.vmem [shape: f32[1,128], index: 1, kind: input, shape index: {}]   ;;  %s272_s2 = inlined_call_operand.vmem [shape: f32[1,128], index: 2, kind: input, shape index: {}]   ;;  %s273_s3 = inlined_call_operand.vmem [shape: f32[4,128], index: 3, kind: input, shape index: {}]   ;;  %s274_s4 = inlined_call_operand.hbm [shape: f32[2,128], index: 4, kind: output, shape index: {}]  }
   0x1   :  { %10 = vsyncpa [#allocation4], 0  ;;  %s193_s15 = smov [#allocation2]   ;;  %s145_s19 = scalar_lea.hbm %s270_s0, 32 }
   0x2   :  { %s17_s16 = sshll.u32 %s193_s15, 4  ;;  %p146_p0 = scmp.ne.s32.totalorder %s270_s0, %s145_s19  ;;  %s18_s16 = int_to_ptr.vmem [resolvable:$true] %s17_s16 }
   0x3   :  { %p149_p1 = scmp.lt.u32.totalorder %s145_s19, %s270_s0 }
   0x5   :  { %p151_p2 = pnand %p149_p1, %p146_p0 }
   0x7   :  { %154 = shalt.err (!%p151_p2)
}
   0x8   :  { %s155_s24 = scalar_lea.vmem %s18_s16, 32  ;;  %p160_p4 = scmp.lt.s32.totalorder %s18_s16, %s18_s16 }
   0x9   :  { %p156_p3 = scmp.ne.s32.totalorder %s18_s16, %s155_s24  ;;  %p161_p5 = scmp.lt.s32.totalorder %s155_s24, %s155_s24 }
   0xb   :  { %p162_p6 = por %p161_p5, %p160_p4 }
   0xd   :  { %p163_p7 = pnand %p162_p6, %p156_p3 }
   0xf   :  { %166 = shalt.err (!%p163_p7)
}
  0x10   :  { %20 = dma.hbm_to_vmem [thread:$0]  %s270_s0, 32, %s18_s16, [#allocation3]  }
  0x11   :  { %189 = dma.done.wait [#allocation3], 32  }
  0x12   :  { %190 = vsyncadd [#allocation3], 4294967264  ;;  %v35_v0 = vlaneseq  ;;  %v32_v5 = vld [vmem:[%s273_s3] sm:$0xf]  ;;  %v235_v6 = vld [vmem:[#allocation2] sm:$0x3] }
  0x13   :  { %v34_v7 = vmul.f32 %v235_v6, %v235_v6  ;;  %vm40_vm0 = vcmask 1041408   ;;  %v139_v59 = vld [vmem:[%s271_s1] ss:$0 sm:$0xff]  ;;  %s194_s5 = smov [#allocation5]  }
  0x14   :  { %v36_v1 = vshrl.u32 %v35_v0, 7  ;;  %v140_v61 = vld [vmem:[%s272_s2] ss:$0 sm:$0xff]  ;;  %s130_s6 = sshll.u32 %s194_s5, 4  ;;  %s131_s6 = int_to_ptr.vmem [resolvable:$true] %s130_s6 }
  0x15   :  { %s167_s7 = scalar_lea.vmem %s131_s6, 32  ;;  %p172_p9 = scmp.lt.s32.totalorder %s131_s6, %s131_s6 }
  0x16   :  { %v37_v2 = vsub.s32 0, %v36_v1  ;;  %v54_v3 = vsub.s32 1, %v36_v1  ;;  %v70_v4 = vsub.s32 2, %v36_v1  ;;  %v86_v11 = vsub.s32 3, %v36_v1  ;;  %p168_p8 = scmp.ne.s32.totalorder %s131_s6, %s167_s7  ;;  %p173_p10 = scmp.lt.s32.totalorder %s167_s7, %s167_s7 }
  0x18   :  { %v38_v8 = vrot.slane %v32_v5, %v37_v2  ;;  %v55_v9 = vrot.slane %v32_v5, %v54_v3  ;;  %v71_v10 = vrot.slane %v32_v5, %v70_v4  ;;  %v87_v18 = vrot.slane %v32_v5, %v86_v11  ;;  %p174_p11 = por %p173_p10, %p172_p9 }
  0x1a   :  { %v46_v12 = vmul.f32 %v38_v8, %v34_v7  ;;  %v39_v13 = vmul.f32 %v38_v8, %v235_v6  ;;  %v62_v14 = vmul.f32 %v55_v9, %v34_v7  ;;  %v56_v15 = vmul.f32 %v55_v9, %v235_v6  ;;  %p175_p12 = pnand %p174_p11, %p168_p8 }
  0x1b   :  { %v78_v21 = vmul.f32 %v71_v10, %v34_v7  ;;  %v72_v22 = vmul.f32 %v71_v10, %v235_v6  ;;  %v94_v25 = vmul.f32 %v87_v18, %v34_v7  ;;  %v88_v26 = vmul.f32 %v87_v18, %v235_v6 }
  0x1c   :  { %v47_v16 = vsel %vm40_vm0, %v46_v12, 0.0  ;;  %v41_v17 = vsel %vm40_vm0, %v39_v13, 0.0  ;;  %v63_v19 = vsel %vm40_vm0, %v62_v14, 0.0  ;;  %v57_v20 = vsel %vm40_vm0, %v56_v15, 0.0 }
  0x1d   :  { %48 = vadd.xlane.f32.xlu1 %v47_v16  ;;  %42 = vadd.xlane.f32.xlu0 %v41_v17  ;;  %v79_v23 = vsel %vm40_vm0, %v78_v21, 0.0  ;;  %v73_v24 = vsel %vm40_vm0, %v72_v22, 0.0  ;;  %v95_v27 = vsel %vm40_vm0, %v94_v25, 0.0  ;;  %v89_v28 = vsel %vm40_vm0, %v88_v26, 0.0 }
  0x21   :  { %64 = vadd.xlane.f32.xlu1 %v63_v19  ;;  %58 = vadd.xlane.f32.xlu0 %v57_v20 }
  0x25   :  { %80 = vadd.xlane.f32.xlu1 %v79_v23  ;;  %74 = vadd.xlane.f32.xlu0 %v73_v24 }
  0x29   :  { %96 = vadd.xlane.f32.xlu1 %v95_v27  ;;  %90 = vadd.xlane.f32.xlu0 %v89_v28 }
  0xaa   :  { %v49_v29 = vpop.xlane.xlu1 %48  ;;  %v43_v30 = vpop.xlane.xlu0 %42 }
  0xab   :  { %v50_v37 = vmul.f32 %v49_v29, %v38_v8  ;;  %v44_v38 = vmul.f32 %v43_v30, %v38_v8 }
  0xae   :  { %v65_v31 = vpop.xlane.xlu1 %64  ;;  %v59_v32 = vpop.xlane.xlu0 %58 }
  0xaf   :  { %v66_v33 = vmul.f32 %v65_v31, %v55_v9  ;;  %v60_v34 = vmul.f32 %v59_v32, %v55_v9 }
  0xb1   :  { %v67_v41 = vadd.f32 %v66_v33, %v50_v37  ;;  %v61_v42 = vadd.f32 %v60_v34, %v44_v38 }
  0xb2   :  { %v81_v35 = vpop.xlane.xlu1 %80  ;;  %v75_v36 = vpop.xlane.xlu0 %74 }
  0xb3   :  { %v82_v39 = vmul.f32 %v81_v35, %v71_v10  ;;  %v76_v40 = vmul.f32 %v75_v36, %v71_v10 }
  0xb5   :  { %v83_v45 = vadd.f32 %v82_v39, %v67_v41  ;;  %v77_v46 = vadd.f32 %v76_v40, %v61_v42 }
  0xb6   :  { %v97_v43 = vpop.xlane.xlu1 %96  ;;  %v91_v44 = vpop.xlane.xlu0 %90 }
  0xb7   :  { %v98_v47 = vmul.f32 %v97_v43, %v87_v18  ;;  %v92_v48 = vmul.f32 %v91_v44, %v87_v18 }
  0xb9   :  { %v99_v49 = vadd.f32 %v98_v47, %v83_v45  ;;  %v93_v50 = vadd.f32 %v92_v48, %v77_v46 }
  0xbb   :  { %v100_v51 = vmul.f32 0.03125, %v93_v50  ;;  %v101_v52 = vmul.f32 0.03125, %v99_v49 }
  0xbd   :  { %v102_v53 = vmul.f32 %v100_v51, %v100_v51  ;;  %v107_v57 = vsub.f32 %v235_v6, %v100_v51 }
  0xbf   :  { %v103_v54 = vsub.f32 %v101_v52, %v102_v53 }
  0xc1   :  { %v104_v55 = vmax.f32 %v103_v54, 0.0 }
  0xc3   :  { %v105_v56 = vadd.f32 1e-05, %v104_v55 }
  0xc5   :  { %143 = vrsqrt.f32 %v105_v56 }
  0xcf   :  { %v144_v58 = vpop.eup %143 }
  0xd0   :  { %v108_v60 = vmul.f32 %v144_v58, %v107_v57 }
  0xd2   :  { %v115_v62 = vmul.f32 %v139_v59, %v108_v60 }
  0xd4   :  { %v122_v63 = vadd.f32 %v140_v61, %v115_v62 }
  0xd6   :  { %123 = vst [vmem:[#allocation5] sm:$0x3] %v122_v63 }
  0xd7   :  { %178 = shalt.err (!%p175_p12)
}
  0xd8   :  { %s179_s9 = scalar_lea.hbm %s274_s4, 32 }
  0xd9   :  { %p180_p13 = scmp.ne.s32.totalorder %s274_s4, %s179_s9  ;;  %p183_p0 = scmp.lt.u32.totalorder %s179_s9, %s274_s4 }
  0xdb   :  { %p185_p1 = pnand %p183_p0, %p180_p13 }
  0xdd   :  { %188 = shalt.err (!%p185_p1)
}
  0xde   :  { %133 = dma.vmem_to_hbm [thread:$0]  %s131_s6, 32, %s274_s4, [#allocation4]  }
  0xdf   :  { %191 = dma.done.wait [#allocation4], 32  }
  0xe0   :  { %192 = vsyncadd [#allocation4], 4294967264 }
  0xe1   :  { %137 = vsyncpa [#allocation3], 1 }
  0xe2   :  { %138 = vsyncpa [#allocation4], 1 }

</bundles_post_ra>
